<compile_context>
chip_gen: v6e
topology: v6e:2x2x1
jax: 0.10.0
libtpu: 0.0.40
codegen_flags: <defaults>
</compile_context>

<pallas_src>
import functools

import jax
import jax.numpy as jnp
from jax.experimental import pallas as pl
from jax.experimental.pallas import tpu as pltpu

LANES = 128
K_CHUNK_MAX = 2048   # max contraction tile (keeps VMEM well under 24 MiB)
M_TILE_MAX = 256     # max rows tile


def _round_up(v, m):
    return ((v + m - 1) // m) * m


def _cdiv(a, b):
    return -(-a // b)


# ----------------------------------------------------------------------------
# Pallas kernel: tiled GEMM (im2col patches x folded conv weight), f32 acc
# ----------------------------------------------------------------------------

def _gemm_kernel(p_ref, w_ref, o_ref, acc_ref):
    @pl.when(pl.program_id(1) == 0)
    def _():
        acc_ref[...] = jnp.zeros_like(acc_ref)

    acc_ref[...] += jnp.dot(p_ref[...], w_ref[...],
                            preferred_element_type=jnp.float32)

    @pl.when(pl.program_id(1) == pl.num_programs(1) - 1)
    def _():
        o_ref[...] = acc_ref[...].astype(o_ref.dtype)


def conv_gemm(patches, weight, *, tm, tk, out_dtype=jnp.float32):
    """patches: (M_pad, K_pad) bf16; weight: (K_pad, COUT_pad) bf16."""
    m_pad, k_pad = patches.shape
    k_w, cout = weight.shape
    assert k_w == k_pad and m_pad % tm == 0 and k_pad % tk == 0
    assert cout % LANES == 0
    grid = (m_pad // tm, k_pad // tk)
    # double-buffered inputs + f32 scratch + double-buffered f32 output tile
    vmem_est = (2 * tm * tk * 2 + 2 * tk * cout * 2
                + tm * cout * 4 + 2 * tm * cout * 4)
    return pl.pallas_call(
        _gemm_kernel,
        out_shape=jax.ShapeDtypeStruct((m_pad, cout), out_dtype),
        grid=grid,
        in_specs=[pl.BlockSpec((tm, tk), lambda i, k: (i, k)),
                  pl.BlockSpec((tk, cout), lambda i, k: (k, 0))],
        out_specs=pl.BlockSpec((tm, cout), lambda i, k: (i, 0)),
        scratch_shapes=[pltpu.VMEM((tm, cout), jnp.float32)],
        compiler_params=pltpu.CompilerParams(
            dimension_semantics=("parallel", "arbitrary"),
            vmem_limit_bytes=min(64 << 20, max(16 << 20, 4 * vmem_est))),
    )(patches, weight)


# ----------------------------------------------------------------------------
# XLA-side im2col (pad / stride / transpose-conv dilation) -> (M, T*Cin)
# ----------------------------------------------------------------------------
# TODO(synk): the spatial window gather stays XLA glue; an in-kernel halo-tile
# gather (pl.ds shifted slices from a VMEM-resident feature map) would remove
# the k^2 HBM round trip but is left out for lowering robustness at stride-2 /
# dilated layers.

def _im2col(x, k, stride, pads, dilate, k_pad):
    """x: (N, H, W, C) NHWC (already activated).  Returns (N*Ho*Wo, k_pad)."""
    n, h, w, c = x.shape
    if dilate > 1:
        hd, wd = (h - 1) * dilate + 1, (w - 1) * dilate + 1
        xd = jnp.zeros((n, hd, wd, c), x.dtype)
        x = xd.at[:, ::dilate, ::dilate, :].set(x)
        h, w = hd, wd
    pt, pb, pleft, pright = pads
    xp = jnp.pad(x, ((0, 0), (pt, pb), (pleft, pright), (0, 0)))
    hp, wp = h + pt + pb, w + pleft + pright
    ho = (hp - k) // stride + 1
    wo = (wp - k) // stride + 1
    taps = []
    for i in range(k):
        for j in range(k):
            taps.append(xp[:, i:i + stride * (ho - 1) + 1:stride,
                           j:j + stride * (wo - 1) + 1:stride, :])
    pat = jnp.stack(taps, axis=3)                  # (N, Ho, Wo, T, C)
    pat = pat.reshape(n * ho * wo, k * k * c)      # tap-major, channel-minor
    if k_pad > k * k * c:
        pat = jnp.pad(pat, ((0, 0), (0, k_pad - k * k * c)))
    return pat, (n, ho, wo)


# ----------------------------------------------------------------------------
# DenseED: deterministic parameter construction + flat forward plan
# ----------------------------------------------------------------------------

def build_dense_ed_plan(key, in_channels, out_channels, blocks, growth_rate,
                        init_features, in_conv_ker_size, out_conv_ker_size):
    """Mirrors DenseED.__init__ (bottleneck=False for dense blocks, drop_rate=0,
    in_combine=False, in_batch_norm=False, in_bias=False, out_activation=None).
    Weights are pre-reshaped to the (K_pad, COUT_pad) GEMM layout consumed by
    the Pallas kernel; BN running stats are folded into scale/shift vectors."""
    state = [key]

    def nk():
        state[0], sub = jax.random.split(state[0])
        return sub

    def conv_w(cin, cout, k):
        # direct Conv2d weight, already (KH, KW, Cin, Cout)
        return 0.1 * jax.random.normal(nk(), (k, k, cin, cout), jnp.float32)

    def convt_w(cin, cout, k):
        # PyTorch ConvTranspose2d weight (Cin, Cout, KH, KW) -> equivalent
        # direct-conv kernel (spatial flip + channel swap), precomputed once.
        w_t = 0.1 * jax.random.normal(nk(), (cin, cout, k, k), jnp.float32)
        return jnp.transpose(jnp.flip(jnp.flip(w_t, -1), -2), (2, 3, 0, 1))

    def bn(c):
        eps = 1e-5
        gamma = 1.0 + 0.1 * jax.random.normal(nk(), (c,), jnp.float32)
        beta = 0.1 * jax.random.normal(nk(), (c,), jnp.float32)
        mean = 0.1 * jax.random.normal(nk(), (c,), jnp.float32)
        var = 1.0 + 0.1 * jnp.abs(jax.random.normal(nk(), (c,), jnp.float32))
        scale = gamma / jnp.sqrt(var + eps)
        shift = beta - mean * scale
        return scale, shift

    plan = []
    num_features = in_channels

    def emit_conv(w4, bnp, k, stride, pads, dilate, append):
        nonlocal num_features
        kh, kw, cin, cout = w4.shape
        assert cin == num_features
        k_true = kh * kw * cin
        nk_chunks = max(1, _cdiv(k_true, K_CHUNK_MAX))
        tk = _round_up(_cdiv(k_true, nk_chunks), LANES)
        k_pad = nk_chunks * tk
        cout_pad = _round_up(cout, LANES)
        w2 = w4.reshape(k_true, cout)
        w2 = jnp.pad(w2, ((0, k_pad - k_true), (0, cout_pad - cout)))
        plan.append(dict(
            weight=w2.astype(jnp.bfloat16),
            scale=bnp[0] if bnp is not None else None,
            shift=bnp[1] if bnp is not None else None,
            k=k, stride=stride, pads=tuple(pads), dilate=dilate,
            tk=tk, k_pad=k_pad, cout=cout, append=append))
        num_features = num_features + cout if append else cout

    assert len(blocks) % 2 == 1
    enc_blocks = blocks[:len(blocks) // 2]
    dec_blocks = blocks[len(blocks) // 2:]

    # In_conv: Conv2d(in_ch, init_features, k, stride=2, pad=(k-1)//2, bias=False)
    p0 = (in_conv_ker_size - 1) // 2
    emit_conv(conv_w(in_channels, init_features, in_conv_ker_size), None,
              in_conv_ker_size, 2, (p0, p0, p0, p0), 1, append=False)

    def dense_block(num_layers):
        # _DenseLayer (bottleneck=False): BN-ReLU-Conv3x3(p=1); concat output
        for _ in range(num_layers):
            nf = num_features
            emit_conv(conv_w(nf, growth_rate, 3), bn(nf), 3, 1, (1, 1, 1, 1), 1,
                      append=True)

    # Encoder: DenseBlock + TransitionDown (bottleneck=True inside _Transition)
    for num_layers in enc_blocks:
        dense_block(num_layers)
        nf = num_features
        out_f = nf // 2
        emit_conv(conv_w(nf, out_f, 1), bn(nf), 1, 1, (0, 0, 0, 0), 1,
                  append=False)
        emit_conv(conv_w(out_f, out_f, 3), bn(out_f), 3, 2, (1, 1, 1, 1), 1,
                  append=False)

    # Decoder: DenseBlock + TransitionUp (except after the last block)
    for i, num_layers in enumerate(dec_blocks):
        dense_block(num_layers)
        if i < len(dec_blocks) - 1:
            nf = num_features
            out_f = nf // 2
            emit_conv(conv_w(nf, out_f, 1), bn(nf), 1, 1, (0, 0, 0, 0), 1,
                      append=False)
            # ConvT(3, s=2, p=1, output_padding=1) -> dilate 2, pads (1, 2)
            emit_conv(convt_w(out_f, out_f, 3), bn(out_f), 3, 1,
                      (1, 2, 1, 2), 2, append=False)

    # LastTransUp: BN-ReLU-Conv1x1 - BN-ReLU-ConvT(k, s=2, p=k//2, op=1)
    nf = num_features
    emit_conv(conv_w(nf, nf // 2, 1), bn(nf), 1, 1, (0, 0, 0, 0), 1,
              append=False)
    ko = out_conv_ker_size
    p_lo = ko - 1 - ko // 2
    p_hi = p_lo + 1                     # + output_padding (= 1)
    emit_conv(convt_w(nf // 2, out_channels, ko), bn(nf // 2), ko, 1,
              (p_lo, p_hi, p_lo, p_hi), 2, append=False)
    # out_activation=None -> identity
    return plan


def dense_ed_forward(plan, x_nchw, out_channels):
    """x_nchw: (N, C, H, W) f32 -> (N, out_channels, H', W') f32 (NCHW)."""
    feat = jnp.transpose(x_nchw, (0, 2, 3, 1))          # NHWC, f32, true chans
    groups = [feat]                                      # dense-block concat
    for op in plan:
        xin = groups[0] if len(groups) == 1 else jnp.concatenate(groups, -1)
        if op['scale'] is not None:
            # folded BatchNorm + ReLU, applied once per element BEFORE the
            # zero padding / dilation (matches the reference ordering exactly)
            xin = jnp.maximum(xin * op['scale'] + op['shift'], 0.0)
        xin = xin.astype(jnp.bfloat16)
        patches, (n, ho, wo) = _im2col(xin, op['k'], op['stride'], op['pads'],
                                       op['dilate'], op['k_pad'])
        m = n * ho * wo
        tm = min(M_TILE_MAX, _round_up(m, 8))
        m_pad = _round_up(m, tm)
        if m_pad > m:
            patches = jnp.pad(patches, ((0, m_pad - m), (0, 0)))
        out2d = conv_gemm(patches, op['weight'], tm=tm, tk=op['tk'],
                          out_dtype=jnp.float32)
        y = out2d[:m, :op['cout']].reshape(n, ho, wo, op['cout'])
        if op['append']:
            groups.append(y)          # _DenseLayer: torch.cat([x, y], dim=1)
        else:
            groups = [y]
    out = groups[0][..., :out_channels]                  # LastTransUp replaces
    return jnp.transpose(out, (0, 3, 1, 2)).astype(jnp.float32)   # -> NCHW


# ----------------------------------------------------------------------------
# Main
# ----------------------------------------------------------------------------

if __name__ == "__main__":
    key = jax.random.PRNGKey(0)
    k_params, k_x = jax.random.split(key)

    # Small DenseED config (odd-length blocks, bottleneck=False, drop_rate=0,
    # out_activation=None), consistent with DenseED.__init__ semantics.
    in_channels = 4
    out_channels = 1
    blocks = [1, 1, 1]
    growth_rate = 8
    init_features = 8
    in_conv_ker_size = 5
    out_conv_ker_size = 4

    plan = build_dense_ed_plan(
        k_params, in_channels, out_channels, blocks, growth_rate,
        init_features, in_conv_ker_size, out_conv_ker_size)

    # Input in PyTorch NCHW convention.
    x = jax.random.normal(k_x, (2, in_channels, 16, 16), jnp.float32)

    fwd = jax.jit(functools.partial(dense_ed_forward, plan,
                                    out_channels=out_channels))
    y = fwd(x)
    jax.block_until_ready(y)

    # (2,4,16,16) -> In_conv s2 -> (2,8,8,8) -> enc dense (2,16,8,8)
    # -> TransDown (2,8,4,4) -> dec dense (2,16,4,4) -> TransUp (2,8,8,8)
    # -> dec dense (2,16,8,8) -> LastTransUp -> (2,1,15,15)
    assert y.shape == (2, out_channels, 15, 15), y.shape
    assert bool(jnp.all(jnp.isfinite(y)))

    # TODO(synk): BatchNorm is inference-mode only (running stats folded);
    # training-mode batch statistics are not reproduced.
    print("KERNEL_OK")
</pallas_src>

<mosaic_0001>
module attributes {stable_mosaic.version = 11 : i64} {
  func.func @_gemm_kernel(%arg0: i32, %arg1: i32, %arg2: memref<128x128xbf16, #tpu.memory_space<vmem>>, %arg3: memref<128x128xbf16, #tpu.memory_space<vmem>>, %arg4: memref<128x128xf32, #tpu.memory_space<vmem>>, %arg5: memref<128x128xf32, #tpu.memory_space<vmem>>) attributes {dimension_semantics = [#tpu.dimension_semantics<parallel>, #tpu.dimension_semantics<arbitrary>], iteration_bounds = array<i64: 1, 1>, scalar_prefetch = 0 : i64, scratch_operands = 1 : i64, tpu.core_type = #tpu.core_type<tc>, window_params = [{transform_indices = @transform_0, window_bounds = array<i64: 128, 128>}, {transform_indices = @transform_1, window_bounds = array<i64: 128, 128>}, {transform_indices = @transform_2, window_bounds = array<i64: 128, 128>}]} {
    %c0_i32 = arith.constant 0 : i32
    %0 = arith.cmpi eq, %arg1, %c0_i32 : i32
    %1 = arith.extui %0 : i1 to i32
    %c0_i32_0 = arith.constant 0 : i32
    %2 = arith.cmpi ne, %1, %c0_i32_0 : i32
    scf.if %2 {
      %cst_10 = arith.constant 0.000000e+00 : f32
      %12 = vector.broadcast %cst_10 : f32 to vector<128x128xf32>
      %c0_11 = arith.constant 0 : index
      %c0_12 = arith.constant 0 : index
      %13 = vector.load %arg5[%c0_11, %c0_12] : memref<128x128xf32, #tpu.memory_space<vmem>>, vector<128x128xf32>
      tpu.vector_store %arg5[%c0_11, %c0_12], %12 {strides = array<i32>} : memref<128x128xf32, #tpu.memory_space<vmem>>, vector<128x128xf32>,
    } else {
    }
    %c0 = arith.constant 0 : index
    %c0_1 = arith.constant 0 : index
    %3 = vector.load %arg5[%c0, %c0_1] : memref<128x128xf32, #tpu.memory_space<vmem>>, vector<128x128xf32>
    %c0_2 = arith.constant 0 : index
    %c0_3 = arith.constant 0 : index
    %4 = vector.load %arg2[%c0_2, %c0_3] : memref<128x128xbf16, #tpu.memory_space<vmem>>, vector<128x128xbf16>
    %c0_4 = arith.constant 0 : index
    %c0_5 = arith.constant 0 : index
    %5 = vector.load %arg3[%c0_4, %c0_5] : memref<128x128xbf16, #tpu.memory_space<vmem>>, vector<128x128xbf16>
    %cst = arith.constant dense<0.000000e+00> : vector<128x128xf32>
    %6 = tpu.matmul %4, %5, %cst {dimension_numbers = #tpu.dot_dimension_numbers<[1], [0], [0], [1], [0, 0, 1, 1], [], []>} : vector<128x128xbf16>, vector<128x128xbf16>, vector<128x128xf32> -> vector<128x128xf32>
    %7 = arith.addf %3, %6 : vector<128x128xf32>
    %c0_6 = arith.constant 0 : index
    %c0_7 = arith.constant 0 : index
    %8 = vector.load %arg5[%c0_6, %c0_7] : memref<128x128xf32, #tpu.memory_space<vmem>>, vector<128x128xf32>
    tpu.vector_store %arg5[%c0_6, %c0_7], %7 {strides = array<i32>} : memref<128x128xf32, #tpu.memory_space<vmem>>, vector<128x128xf32>,
    %c0_i32_8 = arith.constant 0 : i32
    %9 = arith.cmpi eq, %arg1, %c0_i32_8 : i32
    %10 = arith.extui %9 : i1 to i32
    %c0_i32_9 = arith.constant 0 : i32
    %11 = arith.cmpi ne, %10, %c0_i32_9 : i32
    scf.if %11 {
      %c0_10 = arith.constant 0 : index
      %c0_11 = arith.constant 0 : index
      %12 = vector.load %arg5[%c0_10, %c0_11] : memref<128x128xf32, #tpu.memory_space<vmem>>, vector<128x128xf32>
      %c0_12 = arith.constant 0 : index
      %c0_13 = arith.constant 0 : index
      %13 = vector.load %arg4[%c0_12, %c0_13] : memref<128x128xf32, #tpu.memory_space<vmem>>, vector<128x128xf32>
      tpu.vector_store %arg4[%c0_12, %c0_13], %12 {strides = array<i32>} : memref<128x128xf32, #tpu.memory_space<vmem>>, vector<128x128xf32>,
    } else {
    }
    return
  }
  func.func @transform_0(%arg0: i32, %arg1: i32) -> (i32, i32) {
    %c0_i32 = arith.constant 0 : i32
    return %arg0, %arg1 : i32, i32
  }
  func.func @transform_1(%arg0: i32, %arg1: i32) -> (i32, i32) {
    %c0_i32 = arith.constant 0 : i32
    %c0_i32_0 = arith.constant 0 : i32
    return %arg1, %c0_i32 : i32, i32
  }
  func.func @transform_2(%arg0: i32, %arg1: i32) -> (i32, i32) {
    %c0_i32 = arith.constant 0 : i32
    %c0_i32_0 = arith.constant 0 : i32
    return %arg0, %c0_i32 : i32, i32
  }
}

module attributes {stable_mosaic.version = 11 : i64} {
  func.func @_gemm_kernel(%arg0: i32, %arg1: i32, %arg2: memref<32x128xbf16, #tpu.memory_space<vmem>>, %arg3: memref<128x128xbf16, #tpu.memory_space<vmem>>, %arg4: memref<32x128xf32, #tpu.memory_space<vmem>>, %arg5: memref<32x128xf32, #tpu.memory_space<vmem>>) attributes {dimension_semantics = [#tpu.dimension_semantics<parallel>, #tpu.dimension_semantics<arbitrary>], iteration_bounds = array<i64: 1, 1>, scalar_prefetch = 0 : i64, scratch_operands = 1 : i64, tpu.core_type = #tpu.core_type<tc>, window_params = [{transform_indices = @transform_0, window_bounds = array<i64: 32, 128>}, {transform_indices = @transform_1, window_bounds = array<i64: 128, 128>}, {transform_indices = @transform_2, window_bounds = array<i64: 32, 128>}]} {
    %c0_i32 = arith.constant 0 : i32
    %0 = arith.cmpi eq, %arg1, %c0_i32 : i32
    %1 = arith.extui %0 : i1 to i32
    %c0_i32_0 = arith.constant 0 : i32
    %2 = arith.cmpi ne, %1, %c0_i32_0 : i32
    scf.if %2 {
      %cst_10 = arith.constant 0.000000e+00 : f32
      %12 = vector.broadcast %cst_10 : f32 to vector<32x128xf32>
      %c0_11 = arith.constant 0 : index
      %c0_12 = arith.constant 0 : index
      %13 = vector.load %arg5[%c0_11, %c0_12] : memref<32x128xf32, #tpu.memory_space<vmem>>, vector<32x128xf32>
      tpu.vector_store %arg5[%c0_11, %c0_12], %12 {strides = array<i32>} : memref<32x128xf32, #tpu.memory_space<vmem>>, vector<32x128xf32>,
    } else {
    }
    %c0 = arith.constant 0 : index
    %c0_1 = arith.constant 0 : index
    %3 = vector.load %arg5[%c0, %c0_1] : memref<32x128xf32, #tpu.memory_space<vmem>>, vector<32x128xf32>
    %c0_2 = arith.constant 0 : index
    %c0_3 = arith.constant 0 : index
    %4 = vector.load %arg2[%c0_2, %c0_3] : memref<32x128xbf16, #tpu.memory_space<vmem>>, vector<32x128xbf16>
    %c0_4 = arith.constant 0 : index
    %c0_5 = arith.constant 0 : index
    %5 = vector.load %arg3[%c0_4, %c0_5] : memref<128x128xbf16, #tpu.memory_space<vmem>>, vector<128x128xbf16>
    %cst = arith.constant dense<0.000000e+00> : vector<32x128xf32>
    %6 = tpu.matmul %4, %5, %cst {dimension_numbers = #tpu.dot_dimension_numbers<[1], [0], [0], [1], [0, 0, 1, 1], [], []>} : vector<32x128xbf16>, vector<128x128xbf16>, vector<32x128xf32> -> vector<32x128xf32>
    %7 = arith.addf %3, %6 : vector<32x128xf32>
    %c0_6 = arith.constant 0 : index
    %c0_7 = arith.constant 0 : index
    %8 = vector.load %arg5[%c0_6, %c0_7] : memref<32x128xf32, #tpu.memory_space<vmem>>, vector<32x128xf32>
    tpu.vector_store %arg5[%c0_6, %c0_7], %7 {strides = array<i32>} : memref<32x128xf32, #tpu.memory_space<vmem>>, vector<32x128xf32>,
    %c0_i32_8 = arith.constant 0 : i32
    %9 = arith.cmpi eq, %arg1, %c0_i32_8 : i32
    %10 = arith.extui %9 : i1 to i32
    %c0_i32_9 = arith.constant 0 : i32
    %11 = arith.cmpi ne, %10, %c0_i32_9 : i32
    scf.if %11 {
      %c0_10 = arith.constant 0 : index
      %c0_11 = arith.constant 0 : index
      %12 = vector.load %arg5[%c0_10, %c0_11] : memref<32x128xf32, #tpu.memory_space<vmem>>, vector<32x128xf32>
      %c0_12 = arith.constant 0 : index
      %c0_13 = arith.constant 0 : index
      %13 = vector.load %arg4[%c0_12, %c0_13] : memref<32x128xf32, #tpu.memory_space<vmem>>, vector<32x128xf32>
      tpu.vector_store %arg4[%c0_12, %c0_13], %12 {strides = array<i32>} : memref<32x128xf32, #tpu.memory_space<vmem>>, vector<32x128xf32>,
    } else {
    }
    return
  }
  func.func @transform_0(%arg0: i32, %arg1: i32) -> (i32, i32) {
    %c0_i32 = arith.constant 0 : i32
    return %arg0, %arg1 : i32, i32
  }
  func.func @transform_1(%arg0: i32, %arg1: i32) -> (i32, i32) {
    %c0_i32 = arith.constant 0 : i32
    %c0_i32_0 = arith.constant 0 : i32
    return %arg1, %c0_i32 : i32, i32
  }
  func.func @transform_2(%arg0: i32, %arg1: i32) -> (i32, i32) {
    %c0_i32 = arith.constant 0 : i32
    %c0_i32_0 = arith.constant 0 : i32
    return %arg0, %c0_i32 : i32, i32
  }
}

module attributes {stable_mosaic.version = 11 : i64} {
  func.func @_gemm_kernel(%arg0: i32, %arg1: i32, %arg2: memref<256x128xbf16, #tpu.memory_space<vmem>>, %arg3: memref<128x128xbf16, #tpu.memory_space<vmem>>, %arg4: memref<256x128xf32, #tpu.memory_space<vmem>>, %arg5: memref<256x128xf32, #tpu.memory_space<vmem>>) attributes {dimension_semantics = [#tpu.dimension_semantics<parallel>, #tpu.dimension_semantics<arbitrary>], iteration_bounds = array<i64: 2, 1>, scalar_prefetch = 0 : i64, scratch_operands = 1 : i64, tpu.core_type = #tpu.core_type<tc>, window_params = [{transform_indices = @transform_0, window_bounds = array<i64: 256, 128>}, {transform_indices = @transform_1, window_bounds = array<i64: 128, 128>}, {transform_indices = @transform_2, window_bounds = array<i64: 256, 128>}]} {
    %c0_i32 = arith.constant 0 : i32
    %0 = arith.cmpi eq, %arg1, %c0_i32 : i32
    %1 = arith.extui %0 : i1 to i32
    %c0_i32_0 = arith.constant 0 : i32
    %2 = arith.cmpi ne, %1, %c0_i32_0 : i32
    scf.if %2 {
      %cst_10 = arith.constant 0.000000e+00 : f32
      %12 = vector.broadcast %cst_10 : f32 to vector<256x128xf32>
      %c0_11 = arith.constant 0 : index
      %c0_12 = arith.constant 0 : index
      %13 = vector.load %arg5[%c0_11, %c0_12] : memref<256x128xf32, #tpu.memory_space<vmem>>, vector<256x128xf32>
      tpu.vector_store %arg5[%c0_11, %c0_12], %12 {strides = array<i32>} : memref<256x128xf32, #tpu.memory_space<vmem>>, vector<256x128xf32>,
    } else {
    }
    %c0 = arith.constant 0 : index
    %c0_1 = arith.constant 0 : index
    %3 = vector.load %arg5[%c0, %c0_1] : memref<256x128xf32, #tpu.memory_space<vmem>>, vector<256x128xf32>
    %c0_2 = arith.constant 0 : index
    %c0_3 = arith.constant 0 : index
    %4 = vector.load %arg2[%c0_2, %c0_3] : memref<256x128xbf16, #tpu.memory_space<vmem>>, vector<256x128xbf16>
    %c0_4 = arith.constant 0 : index
    %c0_5 = arith.constant 0 : index
    %5 = vector.load %arg3[%c0_4, %c0_5] : memref<128x128xbf16, #tpu.memory_space<vmem>>, vector<128x128xbf16>
    %cst = arith.constant dense<0.000000e+00> : vector<256x128xf32>
    %6 = tpu.matmul %4, %5, %cst {dimension_numbers = #tpu.dot_dimension_numbers<[1], [0], [0], [1], [0, 0, 1, 1], [], []>} : vector<256x128xbf16>, vector<128x128xbf16>, vector<256x128xf32> -> vector<256x128xf32>
    %7 = arith.addf %3, %6 : vector<256x128xf32>
    %c0_6 = arith.constant 0 : index
    %c0_7 = arith.constant 0 : index
    %8 = vector.load %arg5[%c0_6, %c0_7] : memref<256x128xf32, #tpu.memory_space<vmem>>, vector<256x128xf32>
    tpu.vector_store %arg5[%c0_6, %c0_7], %7 {strides = array<i32>} : memref<256x128xf32, #tpu.memory_space<vmem>>, vector<256x128xf32>,
    %c0_i32_8 = arith.constant 0 : i32
    %9 = arith.cmpi eq, %arg1, %c0_i32_8 : i32
    %10 = arith.extui %9 : i1 to i32
    %c0_i32_9 = arith.constant 0 : i32
    %11 = arith.cmpi ne, %10, %c0_i32_9 : i32
    scf.if %11 {
      %c0_10 = arith.constant 0 : index
      %c0_11 = arith.constant 0 : index
      %12 = vector.load %arg5[%c0_10, %c0_11] : memref<256x128xf32, #tpu.memory_space<vmem>>, vector<256x128xf32>
      %c0_12 = arith.constant 0 : index
      %c0_13 = arith.constant 0 : index
      %13 = vector.load %arg4[%c0_12, %c0_13] : memref<256x128xf32, #tpu.memory_space<vmem>>, vector<256x128xf32>
      tpu.vector_store %arg4[%c0_12, %c0_13], %12 {strides = array<i32>} : memref<256x128xf32, #tpu.memory_space<vmem>>, vector<256x128xf32>,
    } else {
    }
    return
  }
  func.func @transform_0(%arg0: i32, %arg1: i32) -> (i32, i32) {
    %c0_i32 = arith.constant 0 : i32
    return %arg0, %arg1 : i32, i32
  }
  func.func @transform_1(%arg0: i32, %arg1: i32) -> (i32, i32) {
    %c0_i32 = arith.constant 0 : i32
    %c0_i32_0 = arith.constant 0 : i32
    return %arg1, %c0_i32 : i32, i32
  }
  func.func @transform_2(%arg0: i32, %arg1: i32) -> (i32, i32) {
    %c0_i32 = arith.constant 0 : i32
    %c0_i32_0 = arith.constant 0 : i32
    return %arg0, %c0_i32 : i32, i32
  }
}

</mosaic_0001>

<bundles_post_ra>
// kernel: dense_ed_forward.10
= control target key start
LH: loop header
LB: loop body
LE: loop exit
PB: predicated region body
PF: predicated region fallthrough
CT: control target
= control target key end

     0   :  { %s551_s1 = inlined_call_operand.vmem [shape: bf16[128,128], index: 1, kind: input, shape index: {}]   ;;  %s552_s0 = inlined_call_operand.vmem [shape: bf16[128,128], index: 0, kind: input, shape index: {}]   ;;  %s553_s2 = inlined_call_operand.vmem [shape: f32[128,128], index: 2, kind: output, shape index: {}]  }
   0x1   :  { %v424_v0 = vld [vmem:[%s551_s1 + $0x38] sm:$0xff]   ;;  %v425_v1 = vld [vmem:[%s551_s1 + $0x30] sm:$0xff]   ;;  %v426_v2 = vld [vmem:[%s551_s1 + $0x28] sm:$0xff]  }
   0x2   :  { %376 = vmatprep.subr.bf16.mxu0 %v424_v0  ;;  %408 = vmatprep.subr.bf16.mxu1 %v424_v0  ;;  %v427_v3 = vld [vmem:[%s551_s1 + $0x20] sm:$0xff]   ;;  %v428_v6 = vld [vmem:[%s551_s1 + $0x18] sm:$0xff]   ;;  %v429_v7 = vld [vmem:[%s551_s1 + $0x10] sm:$0xff]  }
   0x3   :  { %377 = vmatpush3.bf16.msra.mxu0 %v424_v0  ;;  %416 = vmatpush3.bf16.msra.mxu1 %v424_v0  ;;  %v432_v4 = vld [vmem:[%s552_s0] sm:$0xff]   ;;  %v430_v8 = vld [vmem:[%s551_s1 + $0x8] sm:$0xff]   ;;  %v436_v12 = vld [vmem:[%s552_s0 + $0x10] sm:$0xff]  }
   0x4   :  { %378 = vmatprep.subr.bf16.mxu0 %v425_v1  ;;  %409 = vmatprep.subr.bf16.mxu1 %v425_v1  ;;  %v433_v5 = vld [vmem:[%s552_s0 + $0x20] sm:$0xff]   ;;  %v434_v10 = vld [vmem:[%s552_s0 + $0x8] sm:$0xff]   ;;  %v437_v13 = vld [vmem:[%s552_s0 + $0x30] sm:$0xff]  }
   0x5   :  { %392 = vmatprep.mubr.bf16.mxu0 %v432_v4  ;;  %400 = vmatprep.mubr.bf16.mxu1 %v433_v5  ;;  %v431_v9 = vld [vmem:[%s551_s1] sm:$0xff]   ;;  %v435_v11 = vld [vmem:[%s552_s0 + $0x28] sm:$0xff]   ;;  %v438_v14 = vld [vmem:[%s552_s0 + $0x18] sm:$0xff]  }
   0x6   :  { %v439_v15 = vld [vmem:[%s552_s0 + $0x38] sm:$0xff]  }
   0x7   :  { %379 = vmatpush3.bf16.msra.mxu0 %v425_v1  ;;  %417 = vmatpush3.bf16.msra.mxu1 %v425_v1 }
   0x8   :  { %380 = vmatprep.subr.bf16.mxu0 %v426_v2  ;;  %410 = vmatprep.subr.bf16.mxu1 %v426_v2 }
   0xb   :  { %381 = vmatpush3.bf16.msra.mxu0 %v426_v2  ;;  %418 = vmatpush3.bf16.msra.mxu1 %v426_v2 }
   0xc   :  { %382 = vmatprep.subr.bf16.mxu0 %v427_v3  ;;  %411 = vmatprep.subr.bf16.mxu1 %v427_v3 }
   0xf   :  { %383 = vmatpush3.bf16.msra.mxu0 %v427_v3  ;;  %419 = vmatpush3.bf16.msra.mxu1 %v427_v3 }
  0x10   :  { %384 = vmatprep.subr.bf16.mxu0 %v428_v6  ;;  %412 = vmatprep.subr.bf16.mxu1 %v428_v6 }
  0x13   :  { %385 = vmatpush3.bf16.msra.mxu0 %v428_v6  ;;  %420 = vmatpush3.bf16.msra.mxu1 %v428_v6 }
  0x14   :  { %386 = vmatprep.subr.bf16.mxu0 %v429_v7  ;;  %413 = vmatprep.subr.bf16.mxu1 %v429_v7 }
  0x17   :  { %387 = vmatpush3.bf16.msra.mxu0 %v429_v7  ;;  %421 = vmatpush3.bf16.msra.mxu1 %v429_v7 }
  0x18   :  { %388 = vmatprep.subr.bf16.mxu0 %v430_v8  ;;  %414 = vmatprep.subr.bf16.mxu1 %v430_v8 }
  0x1b   :  { %389 = vmatpush3.bf16.msra.mxu0 %v430_v8  ;;  %422 = vmatpush3.bf16.msra.mxu1 %v430_v8 }
  0x1c   :  { %390 = vmatprep.subr.bf16.mxu0 %v431_v9  ;;  %415 = vmatprep.subr.bf16.mxu1 %v431_v9 }
  0x1f   :  { %391 = vmatpush3.bf16.msra.mxu0 %v431_v9  ;;  %423 = vmatpush3.bf16.msra.mxu1 %v431_v9 }
  0x22   :  { %393 = vmatmul.mubr.bf16.vlgmr.msra.gmra.mxu0 %v434_v10  ;;  %401 = vmatmul.mubr.bf16.vlgmr.msra.gmra.mxu1 %v435_v11 }
  0x23   :  { %396 = vmatprep.mubr.bf16.mxu0 %v436_v12  ;;  %404 = vmatprep.mubr.bf16.mxu1 %v437_v13 }
  0x2a   :  { %397 = vmatmul.mubr.bf16.gmra.mxu0 %v438_v14  ;;  %405 = vmatmul.mubr.bf16.gmra.mxu1 %v439_v15 }
  0xe2   :  { %v394_v16 = vpop.f32.mrf.mxu0  ;;  %v402_v17 = vpop.f32.mrf.mxu1 }
  0xe3   :  { %326 = vst [vmem:[%s553_s2 + $0x10] sm:$0xff] %v394_v16  ;;  %334 = vst [vmem:[%s553_s2 + $0x50] sm:$0xff] %v402_v17 }
  0xe4   :  { %v210_v18 = vpop.f32.mrf.mxu0  ;;  %v242_v19 = vpop.f32.mrf.mxu1 }
  0xe5   :  { %324 = vst [vmem:[%s553_s2] sm:$0xff] %v210_v18  ;;  %332 = vst [vmem:[%s553_s2 + $0x40] sm:$0xff] %v242_v19 }
  0xe6   :  { %v395_v20 = vpop.f32.mrf.mxu0  ;;  %v403_v21 = vpop.f32.mrf.mxu1 }
  0xe7   :  { %327 = vst [vmem:[%s553_s2 + $0x18] sm:$0xff] %v395_v20  ;;  %335 = vst [vmem:[%s553_s2 + $0x58] sm:$0xff] %v403_v21 }
  0xe8   :  { %v213_v22 = vpop.f32.mrf.mxu0  ;;  %v245_v23 = vpop.f32.mrf.mxu1 }
  0xe9   :  { %325 = vst [vmem:[%s553_s2 + $0x8] sm:$0xff] %v213_v22  ;;  %333 = vst [vmem:[%s553_s2 + $0x48] sm:$0xff] %v245_v23 }
  0xea   :  { %v398_v24 = vpop.f32.mrf.mxu0  ;;  %v406_v25 = vpop.f32.mrf.mxu1 }
  0xeb   :  { %330 = vst [vmem:[%s553_s2 + $0x30] sm:$0xff] %v398_v24  ;;  %338 = vst [vmem:[%s553_s2 + $0x70] sm:$0xff] %v406_v25 }
  0xec   :  { %v226_v26 = vpop.f32.mrf.mxu0  ;;  %v258_v27 = vpop.f32.mrf.mxu1 }
  0xed   :  { %328 = vst [vmem:[%s553_s2 + $0x20] sm:$0xff] %v226_v26  ;;  %336 = vst [vmem:[%s553_s2 + $0x60] sm:$0xff] %v258_v27 }
  0xee   :  { %v399_v28 = vpop.f32.mrf.mxu0  ;;  %v407_v29 = vpop.f32.mrf.mxu1 }
  0xef   :  { %331 = vst [vmem:[%s553_s2 + $0x38] sm:$0xff] %v399_v28  ;;  %339 = vst [vmem:[%s553_s2 + $0x78] sm:$0xff] %v407_v29 }
  0xf0   :  { %v229_v30 = vpop.f32.mrf.mxu0  ;;  %v261_v31 = vpop.f32.mrf.mxu1 }
  0xf1   :  { %329 = vst [vmem:[%s553_s2 + $0x28] sm:$0xff] %v229_v30  ;;  %337 = vst [vmem:[%s553_s2 + $0x68] sm:$0xff] %v261_v31 }

// kernel: dense_ed_forward.13
= control target key start
LH: loop header
LB: loop body
LE: loop exit
PB: predicated region body
PF: predicated region fallthrough
CT: control target
= control target key end

     0   :  { %s283_s1 = inlined_call_operand.vmem [shape: bf16[128,128], index: 1, kind: input, shape index: {}]   ;;  %s284_s0 = inlined_call_operand.vmem [shape: bf16[32,128], index: 0, kind: input, shape index: {}]   ;;  %s285_s2 = inlined_call_operand.vmem [shape: f32[32,128], index: 2, kind: output, shape index: {}]  }
   0x1   :  { %v216_v0 = vld [vmem:[%s283_s1 + $0x38] sm:$0xff]   ;;  %v217_v1 = vld [vmem:[%s283_s1 + $0x30] sm:$0xff]   ;;  %v218_v2 = vld [vmem:[%s283_s1 + $0x28] sm:$0xff]  }
   0x2   :  { %196 = vmatprep.subr.bf16.mxu0 %v216_v0  ;;  %v219_v3 = vld [vmem:[%s283_s1 + $0x20] sm:$0xff]   ;;  %v220_v5 = vld [vmem:[%s283_s1 + $0x18] sm:$0xff]   ;;  %v221_v6 = vld [vmem:[%s283_s1 + $0x10] sm:$0xff]  }
   0x3   :  { %197 = vmatpush3.bf16.msra.mxu0 %v216_v0  ;;  %v224_v4 = vld [vmem:[%s284_s0] sm:$0xff]   ;;  %v222_v7 = vld [vmem:[%s283_s1 + $0x8] sm:$0xff]  }
   0x4   :  { %198 = vmatprep.subr.bf16.mxu0 %v217_v1  ;;  %212 = vmatprep.mubr.bf16.mxu0 %v224_v4  ;;  %v223_v8 = vld [vmem:[%s283_s1] sm:$0xff]   ;;  %v225_v9 = vld [vmem:[%s284_s0 + $0x8] sm:$0xff]  }
   0x7   :  { %199 = vmatpush3.bf16.msra.mxu0 %v217_v1 }
   0x8   :  { %200 = vmatprep.subr.bf16.mxu0 %v218_v2 }
   0xb   :  { %201 = vmatpush3.bf16.msra.mxu0 %v218_v2 }
   0xc   :  { %202 = vmatprep.subr.bf16.mxu0 %v219_v3 }
   0xf   :  { %203 = vmatpush3.bf16.msra.mxu0 %v219_v3 }
  0x10   :  { %204 = vmatprep.subr.bf16.mxu0 %v220_v5 }
  0x13   :  { %205 = vmatpush3.bf16.msra.mxu0 %v220_v5 }
  0x14   :  { %206 = vmatprep.subr.bf16.mxu0 %v221_v6 }
  0x17   :  { %207 = vmatpush3.bf16.msra.mxu0 %v221_v6 }
  0x18   :  { %208 = vmatprep.subr.bf16.mxu0 %v222_v7 }
  0x1b   :  { %209 = vmatpush3.bf16.msra.mxu0 %v222_v7 }
  0x1c   :  { %210 = vmatprep.subr.bf16.mxu0 %v223_v8 }
  0x1f   :  { %211 = vmatpush3.bf16.msra.mxu0 %v223_v8 }
  0x22   :  { %213 = vmatmul.mubr.bf16.vlgmr.msra.gmra.mxu0 %v225_v9 }
  0xe2   :  { %v214_v10 = vpop.f32.mrf.mxu0 }
  0xe3   :  { %170 = vst [vmem:[%s285_s2 + $0x10] sm:$0xff] %v214_v10 }
  0xe4   :  { %v138_v11 = vpop.f32.mrf.mxu0 }
  0xe5   :  { %168 = vst [vmem:[%s285_s2] sm:$0xff] %v138_v11 }
  0xe6   :  { %v215_v12 = vpop.f32.mrf.mxu0 }
  0xe7   :  { %171 = vst [vmem:[%s285_s2 + $0x18] sm:$0xff] %v215_v12 }
  0xe8   :  { %v141_v13 = vpop.f32.mrf.mxu0 }
  0xe9   :  { %169 = vst [vmem:[%s285_s2 + $0x8] sm:$0xff] %v141_v13 }

// kernel: dense_ed_forward.19
= control target key start
LH: loop header
LB: loop body
LE: loop exit
PB: predicated region body
PF: predicated region fallthrough
CT: control target
= control target key end

     0   :  { %s1039_s9 = smov 0   ;;  %s1041_s10 = smov 0   ;;  %s1152_s0 = inlined_call_operand.vmem [shape: bf16[512,128], index: 0, kind: input, shape index: {}]   ;;  %s1153_s1 = inlined_call_operand.vmem [shape: bf16[128,128], index: 1, kind: input, shape index: {}]   ;;  %s1154_s2 = inlined_call_operand.vmem [shape: f32[512,128], index: 2, kind: output, shape index: {}]  }
   0x1   :  { %s1043_s11 = smov 0  }
   0x2 LB: > { %s24_s12 = sadd.s32 1, %s1018_s10  ;;  %p833_p0 = scmp.ge.s32.totalorder %s1022_s11, 1  ;;  %s1022_s11 = sphi %s1043_s11, %s12_s11   ;;  %s1018_s10 = sphi %s1041_s10, %s1156_s10   ;;  %s1014_s9 = sphi %s1039_s9, %s1155_s9  }
   0x3   : > { %p26_p1 = scmp.ge.s32.totalorder %s24_s12, 2  ;;  %p141_p2 = scmp.lt.s32.totalorder %s1022_s11, 3 }
   0x5   : > { %s1158_s12 = smov (%p26_p1, %s24_s12), 0  ;;  %p142_p3 = pnand %p833_p0, %p141_p2 }
   0x6   : > { %s834_s15 = sshll.u32 (!%p142_p3), %s1014_s9, 5 }
   0x7   : > { %145 = sbr.rel (%p142_p3) target bundleno = 269 (0x10d), region = 28  ;;  %p172_p4 = scmp.lt.s32.totalorder (!%p142_p3), %s834_s15, 63 }
   0xc   : > { %v976_v0 = vld [vmem:[%s1153_s1 + $0x38] sm:$0xff]   ;;  %v977_v1 = vld [vmem:[%s1153_s1 + $0x30] sm:$0xff]   ;;  %s1160_s15 = smov (!%p172_p4, %s834_s15), 63  ;;  %v978_v2 = vld [vmem:[%s1153_s1 + $0x28] sm:$0xff]  }
   0xd   : > { %888 = vmatprep.subr.bf16.mxu0 %v976_v0  ;;  %936 = vmatprep.subr.bf16.mxu1 %v976_v0  ;;  %s835_s20 = sshll.u32 %s1160_s15, 2  ;;  %v979_v3 = vld [vmem:[%s1153_s1 + $0x20] sm:$0xff]   ;;  %v980_v6 = vld [vmem:[%s1153_s1 + $0x18] sm:$0xff]   ;;  %v981_v7 = vld [vmem:[%s1153_s1 + $0x10] sm:$0xff]   ;;  %s837_s6 = sshll.u32 %s1160_s15, 3 }
   0xe   : > { %889 = vmatpush3.bf16.msra.mxu0 %v976_v0  ;;  %944 = vmatpush3.bf16.msra.mxu1 %v976_v0  ;;  %s1072_s23 = scalar_lea.vmem %s1152_s0, %s835_s20  ;;  %v982_v8 = vld [vmem:[%s1153_s1 + $0x8] sm:$0xff]   ;;  %v983_v9 = vld [vmem:[%s1153_s1] sm:$0xff]   ;;  %s1109_s9 = scalar_lea.vmem %s1154_s2, %s837_s6 }
   0xf   : > { %890 = vmatprep.subr.bf16.mxu0 %v977_v1  ;;  %937 = vmatprep.subr.bf16.mxu1 %v977_v1  ;;  %v984_v4 = vld [vmem:[%s1072_s23] sm:$0xff]   ;;  %v986_v10 = vld [vmem:[%s1072_s23 + $0x8] sm:$0xff]   ;;  %v988_v12 = vld [vmem:[%s1072_s23 + $0x10] sm:$0xff]  }
  0x10   : > { %v985_v5 = vld [vmem:[%s1072_s23 + $0x40] sm:$0xff]   ;;  %904 = vmatprep.mubr.bf16.mxu0 %v984_v4  ;;  %v987_v11 = vld [vmem:[%s1072_s23 + $0x48] sm:$0xff]   ;;  %v989_v13 = vld [vmem:[%s1072_s23 + $0x50] sm:$0xff]  }
  0x11   : > { %920 = vmatprep.mubr.bf16.mxu1 %v985_v5  ;;  %v990_v14 = vld [vmem:[%s1072_s23 + $0x18] sm:$0xff]   ;;  %v992_v16 = vld [vmem:[%s1072_s23 + $0x20] sm:$0xff]   ;;  %v994_v18 = vld [vmem:[%s1072_s23 + $0x28] sm:$0xff]  }
  0x12   : > { %891 = vmatpush3.bf16.msra.mxu0 %v977_v1  ;;  %945 = vmatpush3.bf16.msra.mxu1 %v977_v1  ;;  %v991_v15 = vld [vmem:[%s1072_s23 + $0x58] sm:$0xff]   ;;  %v993_v17 = vld [vmem:[%s1072_s23 + $0x60] sm:$0xff]   ;;  %v995_v19 = vld [vmem:[%s1072_s23 + $0x68] sm:$0xff]  }
  0x13   : > { %892 = vmatprep.subr.bf16.mxu0 %v978_v2  ;;  %938 = vmatprep.subr.bf16.mxu1 %v978_v2  ;;  %v996_v20 = vld [vmem:[%s1072_s23 + $0x30] sm:$0xff]   ;;  %v998_v22 = vld [vmem:[%s1072_s23 + $0x38] sm:$0xff]  }
  0x14   : > { %v997_v21 = vld [vmem:[%s1072_s23 + $0x70] sm:$0xff]   ;;  %v999_v23 = vld [vmem:[%s1072_s23 + $0x78] sm:$0xff]  }
  0x16   : > { %893 = vmatpush3.bf16.msra.mxu0 %v978_v2  ;;  %946 = vmatpush3.bf16.msra.mxu1 %v978_v2 }
  0x17   : > { %894 = vmatprep.subr.bf16.mxu0 %v979_v3  ;;  %939 = vmatprep.subr.bf16.mxu1 %v979_v3 }
  0x1a   : > { %895 = vmatpush3.bf16.msra.mxu0 %v979_v3  ;;  %947 = vmatpush3.bf16.msra.mxu1 %v979_v3 }
  0x1b   : > { %896 = vmatprep.subr.bf16.mxu0 %v980_v6  ;;  %940 = vmatprep.subr.bf16.mxu1 %v980_v6 }
  0x1e   : > { %897 = vmatpush3.bf16.msra.mxu0 %v980_v6  ;;  %948 = vmatpush3.bf16.msra.mxu1 %v980_v6 }
  0x1f   : > { %898 = vmatprep.subr.bf16.mxu0 %v981_v7  ;;  %941 = vmatprep.subr.bf16.mxu1 %v981_v7 }
  0x22   : > { %899 = vmatpush3.bf16.msra.mxu0 %v981_v7  ;;  %949 = vmatpush3.bf16.msra.mxu1 %v981_v7 }
  0x23   : > { %900 = vmatprep.subr.bf16.mxu0 %v982_v8  ;;  %942 = vmatprep.subr.bf16.mxu1 %v982_v8 }
  0x26   : > { %901 = vmatpush3.bf16.msra.mxu0 %v982_v8  ;;  %950 = vmatpush3.bf16.msra.mxu1 %v982_v8 }
  0x27   : > { %902 = vmatprep.subr.bf16.mxu0 %v983_v9  ;;  %943 = vmatprep.subr.bf16.mxu1 %v983_v9 }
  0x2a   : > { %903 = vmatpush3.bf16.msra.mxu0 %v983_v9  ;;  %951 = vmatpush3.bf16.msra.mxu1 %v983_v9 }
  0x2d   : > { %905 = vmatmul.mubr.bf16.vlgmr.msra.gmra.mxu0 %v986_v10  ;;  %921 = vmatmul.mubr.bf16.vlgmr.msra.gmra.mxu1 %v987_v11 }
  0x2e   : > { %908 = vmatprep.mubr.bf16.mxu0 %v988_v12  ;;  %924 = vmatprep.mubr.bf16.mxu1 %v989_v13 }
  0x35   : > { %909 = vmatmul.mubr.bf16.gmra.mxu0 %v990_v14  ;;  %925 = vmatmul.mubr.bf16.gmra.mxu1 %v991_v15 }
  0x36   : > { %912 = vmatprep.mubr.bf16.mxu0 %v992_v16  ;;  %928 = vmatprep.mubr.bf16.mxu1 %v993_v17 }
  0x3d   : > { %913 = vmatmul.mubr.bf16.gmra.mxu0 %v994_v18  ;;  %929 = vmatmul.mubr.bf16.gmra.mxu1 %v995_v19 }
  0x3e   : > { %916 = vmatprep.mubr.bf16.mxu0 %v996_v20  ;;  %932 = vmatprep.mubr.bf16.mxu1 %v997_v21 }
  0x45   : > { %917 = vmatmul.mubr.bf16.gmra.mxu0 %v998_v22  ;;  %933 = vmatmul.mubr.bf16.gmra.mxu1 %v999_v23 }
  0xed   : > { %v906_v24 = vpop.f32.mrf.mxu0  ;;  %v922_v25 = vpop.f32.mrf.mxu1 }
  0xee   : > { %715 = vst [vmem:[%s1109_s9 + $0x10] sm:$0xff] %v906_v24  ;;  %731 = vst [vmem:[%s1109_s9 + $0x90] sm:$0xff] %v922_v25 }
  0xef   : > { %v487_v26 = vpop.f32.mrf.mxu0  ;;  %v551_v27 = vpop.f32.mrf.mxu1 }
  0xf0   : > { %713 = vst [vmem:[%s1109_s9] sm:$0xff] %v487_v26  ;;  %729 = vst [vmem:[%s1109_s9 + $0x80] sm:$0xff] %v551_v27 }
  0xf1   : > { %v907_v28 = vpop.f32.mrf.mxu0  ;;  %v923_v29 = vpop.f32.mrf.mxu1 }
  0xf2   : > { %716 = vst [vmem:[%s1109_s9 + $0x18] sm:$0xff] %v907_v28  ;;  %732 = vst [vmem:[%s1109_s9 + $0x98] sm:$0xff] %v923_v29 }
  0xf3   : > { %v490_v30 = vpop.f32.mrf.mxu0  ;;  %v554_v31 = vpop.f32.mrf.mxu1 }
  0xf4   : > { %714 = vst [vmem:[%s1109_s9 + $0x8] sm:$0xff] %v490_v30  ;;  %730 = vst [vmem:[%s1109_s9 + $0x88] sm:$0xff] %v554_v31 }
  0xf5   : > { %v910_v32 = vpop.f32.mrf.mxu0  ;;  %v926_v33 = vpop.f32.mrf.mxu1 }
  0xf6   : > { %719 = vst [vmem:[%s1109_s9 + $0x30] sm:$0xff] %v910_v32  ;;  %735 = vst [vmem:[%s1109_s9 + $0xb0] sm:$0xff] %v926_v33 }
  0xf7   : > { %v503_v34 = vpop.f32.mrf.mxu0  ;;  %v567_v35 = vpop.f32.mrf.mxu1 }
  0xf8   : > { %717 = vst [vmem:[%s1109_s9 + $0x20] sm:$0xff] %v503_v34  ;;  %733 = vst [vmem:[%s1109_s9 + $0xa0] sm:$0xff] %v567_v35 }
  0xf9   : > { %v911_v36 = vpop.f32.mrf.mxu0  ;;  %v927_v37 = vpop.f32.mrf.mxu1 }
  0xfa   : > { %720 = vst [vmem:[%s1109_s9 + $0x38] sm:$0xff] %v911_v36  ;;  %736 = vst [vmem:[%s1109_s9 + $0xb8] sm:$0xff] %v927_v37 }
  0xfb   : > { %v506_v38 = vpop.f32.mrf.mxu0  ;;  %v570_v39 = vpop.f32.mrf.mxu1 }
  0xfc   : > { %718 = vst [vmem:[%s1109_s9 + $0x28] sm:$0xff] %v506_v38  ;;  %734 = vst [vmem:[%s1109_s9 + $0xa8] sm:$0xff] %v570_v39 }
  0xfd   : > { %v914_v40 = vpop.f32.mrf.mxu0  ;;  %v930_v41 = vpop.f32.mrf.mxu1 }
  0xfe   : > { %723 = vst [vmem:[%s1109_s9 + $0x50] sm:$0xff] %v914_v40  ;;  %739 = vst [vmem:[%s1109_s9 + $0xd0] sm:$0xff] %v930_v41 }
  0xff   : > { %v519_v42 = vpop.f32.mrf.mxu0  ;;  %v583_v43 = vpop.f32.mrf.mxu1 }
 0x100   : > { %721 = vst [vmem:[%s1109_s9 + $0x40] sm:$0xff] %v519_v42  ;;  %737 = vst [vmem:[%s1109_s9 + $0xc0] sm:$0xff] %v583_v43 }
 0x101   : > { %v915_v44 = vpop.f32.mrf.mxu0  ;;  %v931_v45 = vpop.f32.mrf.mxu1 }
 0x102   : > { %724 = vst [vmem:[%s1109_s9 + $0x58] sm:$0xff] %v915_v44  ;;  %740 = vst [vmem:[%s1109_s9 + $0xd8] sm:$0xff] %v931_v45 }
 0x103   : > { %v522_v46 = vpop.f32.mrf.mxu0  ;;  %v586_v47 = vpop.f32.mrf.mxu1 }
 0x104   : > { %722 = vst [vmem:[%s1109_s9 + $0x48] sm:$0xff] %v522_v46  ;;  %738 = vst [vmem:[%s1109_s9 + $0xc8] sm:$0xff] %v586_v47 }
 0x105   : > { %v918_v48 = vpop.f32.mrf.mxu0  ;;  %v934_v49 = vpop.f32.mrf.mxu1 }
 0x106   : > { %727 = vst [vmem:[%s1109_s9 + $0x70] sm:$0xff] %v918_v48  ;;  %743 = vst [vmem:[%s1109_s9 + $0xf0] sm:$0xff] %v934_v49 }
 0x107   : > { %v535_v50 = vpop.f32.mrf.mxu0  ;;  %v599_v51 = vpop.f32.mrf.mxu1 }
 0x108   : > { %725 = vst [vmem:[%s1109_s9 + $0x60] sm:$0xff] %v535_v50  ;;  %741 = vst [vmem:[%s1109_s9 + $0xe0] sm:$0xff] %v599_v51 }
 0x109   : > { %v919_v52 = vpop.f32.mrf.mxu0  ;;  %v935_v53 = vpop.f32.mrf.mxu1 }
 0x10a   : > { %728 = vst [vmem:[%s1109_s9 + $0x78] sm:$0xff] %v919_v52  ;;  %744 = vst [vmem:[%s1109_s9 + $0xf8] sm:$0xff] %v935_v53 }
 0x10b   : > { %v538_v54 = vpop.f32.mrf.mxu0  ;;  %v602_v55 = vpop.f32.mrf.mxu1 }
 0x10c   : > { %726 = vst [vmem:[%s1109_s9 + $0x68] sm:$0xff] %v538_v54  ;;  %742 = vst [vmem:[%s1109_s9 + $0xe8] sm:$0xff] %v602_v55 }
 0x10d PF: > { %s12_s11 = sadd.s32 1, %s1022_s11   ;;  %s1155_s9 = smov %s1018_s10 }
 0x10e   : > { %p9_p5 = scmp.ge.s32.totalorder %s12_s11, 4   ;;  %s1156_s10 = smov %s1158_s12 }
 0x110   :  { %11 = sbr.rel (!%p9_p5) target bundleno = 2 (0x2), region = 69 }

</bundles_post_ra>
